<compile_context>
chip_gen: v5e
topology: v5e:2x2
jax: 0.10.0
libtpu: 0.0.40
codegen_flags: <defaults>
</compile_context>

<pallas_src>
import functools

import jax
import jax.numpy as jnp
from jax.experimental import pallas as pl
from jax.experimental.pallas import tpu as pltpu


# ---------------------------------------------------------------------------
# Kernels
# ---------------------------------------------------------------------------

def _write_sincos(sinusoid, out_ref, d2, split_halves):
    """Compute sin/cos of `sinusoid` (f32) and store [sin | cos] into out_ref."""
    if split_halves:
        # d2 % 128 == 0: two lane-aligned, unmasked full-width stores; no concat temp.
        out_ref[:, :d2] = jnp.sin(sinusoid).astype(out_ref.dtype)
        out_ref[:, d2:] = jnp.cos(sinusoid).astype(out_ref.dtype)
    else:
        # Fallback for non-128-aligned d2 (small/test configs): single whole-tile store.
        row = jnp.concatenate([jnp.sin(sinusoid), jnp.cos(sinusoid)], axis=-1)
        out_ref[...] = row.astype(out_ref.dtype)


def _pos_emb_kernel(pos_ref, inv_ref, out_ref, *, d2, split_halves):
    # pos_ref: (TL, 1) f32, inv_ref: (1, D2) f32, out_ref: (TL, 2*D2) out_dtype
    sinusoid = pos_ref[...] * inv_ref[...]          # rank-1 outer product on the VPU
    _write_sincos(sinusoid, out_ref, d2, split_halves)


def _pos_emb_iota_kernel(inv_ref, out_ref, *, d2, split_halves, tl, pos_start, pos_step):
    # Positions computed in-kernel: pos = pos_start + pos_step * (i*TL + row).
    base = (pl.program_id(0) * tl).astype(jnp.float32)
    row = jax.lax.broadcasted_iota(jnp.float32, (tl, 1), 0)
    pos = pos_start + pos_step * (base + row)       # (TL, 1) f32
    sinusoid = pos * inv_ref[...]                   # (TL, D2) f32
    _write_sincos(sinusoid, out_ref, d2, split_halves)


# ---------------------------------------------------------------------------
# Tile selection & shared pallas_call plumbing
# ---------------------------------------------------------------------------

def _choose_row_tile(L, demb, out_dtype, row_tile):
    """Pick the row tile by bytes, with generation-aware VMEM caps."""
    out_bytes = jnp.dtype(out_dtype).itemsize
    row_mult = 16 if out_bytes < 4 else 8           # bf16 sublane packing wants x16
    if row_tile is not None:
        tl = int(row_tile)
    else:
        target_bytes = 2 << 20                      # ~2 MiB output block (amortize step overhead)
        vmem_cap_bytes = 12 << 20                   # safe under v5e 16 MiB scoped VMEM
        per_row_out = demb * out_bytes
        # double-buffered output block + f32 sinusoid/sin/cos temporaries (conservative)
        per_row_vmem = 2 * per_row_out + 3 * demb * 4
        tl = min(target_bytes // max(per_row_out, 1),
                 vmem_cap_bytes // max(per_row_vmem, 1))
        tl = max(row_mult, min(int(tl), 2048))
    # Give the grid >= 2 steps when L allows so "parallel" can split L across v7x's 2 TCs.
    if L > 2 * row_mult:
        tl = min(tl, max(row_mult, L // 2))
    if tl >= L:
        return L                                    # single full-extent block
    tl = (tl // row_mult) * row_mult
    return max(tl, row_mult)


def _call_pos_emb(kernel, in_arrays, in_specs, L, demb, out_dtype, tl):
    d2 = demb // 2
    out_bytes = jnp.dtype(out_dtype).itemsize
    grid = (pl.cdiv(L, tl),)
    cost = pl.CostEstimate(
        flops=L * d2,
        transcendentals=2 * L * d2,
        bytes_accessed=L * demb * out_bytes + L * 4 + d2 * 4,
    )
    return pl.pallas_call(
        kernel,
        out_shape=jax.ShapeDtypeStruct((L, demb), out_dtype),
        grid=grid,
        in_specs=in_specs,
        out_specs=pl.BlockSpec((tl, demb), lambda i: (i, 0)),
        compiler_params=pltpu.CompilerParams(
            dimension_semantics=("parallel",),      # megacore split of the L axis
        ),
        cost_estimate=cost,
    )(*in_arrays)


# ---------------------------------------------------------------------------
# Public wrappers (forward-pass semantics of PositionalEmbedding)
# ---------------------------------------------------------------------------

def _inv_freq(demb):
    # Deterministic buffer (matches the PyTorch __init__).
    return 1.0 / (10000.0 ** (jnp.arange(0.0, demb, 2.0, dtype=jnp.float32) / demb))


def positional_embedding(pos_seq, demb, bsz=None, *, out_dtype=jnp.float32, row_tile=None):
    """JAX/Pallas equivalent of PositionalEmbedding.forward for arbitrary pos_seq.

    pos_seq: (L,) float array.  Returns (L, 1, demb) or (L, bsz, demb) in `out_dtype`.
    """
    assert demb % 2 == 0, "demb must be even"
    d2 = demb // 2
    L = pos_seq.shape[0]

    pos_2d = pos_seq.astype(jnp.float32).reshape(L, 1)
    inv_2d = _inv_freq(demb).reshape(1, d2)

    tl = _choose_row_tile(L, demb, out_dtype, row_tile)
    split = (d2 % 128 == 0)
    kernel = functools.partial(_pos_emb_kernel, d2=d2, split_halves=split)
    in_specs = [
        pl.BlockSpec((tl, 1), lambda i: (i, 0)),    # per-tile positions
        pl.BlockSpec((1, d2), lambda i: (0, 0)),    # inv_freq: resident across tiles
    ]
    pos_emb = _call_pos_emb(kernel, (pos_2d, inv_2d), in_specs, L, demb, out_dtype, tl)

    pos_emb = pos_emb[:, None, :]                   # (L, 1, demb)
    if bsz is not None:
        # torch .expand(-1, bsz, -1) equivalent; kept as a broadcast (view-like).
        pos_emb = jnp.broadcast_to(pos_emb, (L, bsz, demb))
    return pos_emb


def positional_embedding_from_range(seq_len, demb, bsz=None, *, pos_start, pos_step=-1.0,
                                    out_dtype=jnp.float32, row_tile=None):
    """Opt-in fast path: positions are pos_start + pos_step * arange(seq_len),
    generated in-kernel (no (L, 1) position DMA)."""
    assert demb % 2 == 0, "demb must be even"
    d2 = demb // 2
    L = int(seq_len)

    inv_2d = _inv_freq(demb).reshape(1, d2)
    tl = _choose_row_tile(L, demb, out_dtype, row_tile)
    split = (d2 % 128 == 0)
    kernel = functools.partial(
        _pos_emb_iota_kernel, d2=d2, split_halves=split, tl=tl,
        pos_start=float(pos_start), pos_step=float(pos_step),
    )
    in_specs = [pl.BlockSpec((1, d2), lambda i: (0, 0))]
    pos_emb = _call_pos_emb(kernel, (inv_2d,), in_specs, L, demb, out_dtype, tl)

    pos_emb = pos_emb[:, None, :]
    if bsz is not None:
        pos_emb = jnp.broadcast_to(pos_emb, (L, bsz, demb))
    return pos_emb


# ---------------------------------------------------------------------------
# Self-test
# ---------------------------------------------------------------------------

if __name__ == "__main__":
    key = jax.random.PRNGKey(0)   # values are deterministic by construction
    _ = key

    demb = 32
    L = 16
    bsz = 2

    # Transformer-XL passes a descending position sequence.
    pos_seq = jnp.arange(L - 1, -1, -1.0, dtype=jnp.float32)

    # Plain-JAX reference.
    inv_freq = _inv_freq(demb)
    sinusoid = jnp.outer(pos_seq, inv_freq)
    ref = jnp.concatenate([jnp.sin(sinusoid), jnp.cos(sinusoid)], axis=-1)[:, None, :]

    out = positional_embedding(pos_seq, demb)                        # concat path, single block
    out_b = positional_embedding(pos_seq, demb, bsz=bsz)             # (L, bsz, demb)
    out_bf = positional_embedding(pos_seq, demb, out_dtype=jnp.bfloat16)
    out_iota = positional_embedding_from_range(L, demb, pos_start=float(L - 1), pos_step=-1.0)

    # Tiled path with a non-divisible L (partial last tile is masked on store).
    L2 = 20
    pos_seq2 = jnp.arange(L2 - 1, -1, -1.0, dtype=jnp.float32)
    sinusoid2 = jnp.outer(pos_seq2, inv_freq)
    ref2 = jnp.concatenate([jnp.sin(sinusoid2), jnp.cos(sinusoid2)], axis=-1)[:, None, :]
    out_tiled = positional_embedding(pos_seq2, demb, row_tile=8)     # grid=(3,)

    # 128-lane-aligned half: exercises the split-store (no-concat) path.
    demb3 = 256
    inv3 = _inv_freq(demb3)
    sin3 = jnp.outer(pos_seq, inv3)
    ref3 = jnp.concatenate([jnp.sin(sin3), jnp.cos(sin3)], axis=-1)[:, None, :]
    out_split = positional_embedding(pos_seq, demb3)

    jax.block_until_ready((out, out_b, out_bf, out_iota, out_tiled, out_split))

    assert out.shape == (L, 1, demb)
    assert out_b.shape == (L, bsz, demb)
    assert out_tiled.shape == (L2, 1, demb)
    assert out_split.shape == (L, 1, demb3)
    assert jnp.allclose(out, ref, atol=1e-6)
    assert jnp.allclose(out_b, jnp.broadcast_to(ref, (L, bsz, demb)), atol=1e-6)
    assert jnp.allclose(out_bf.astype(jnp.float32), ref, atol=2e-2)
    assert jnp.allclose(out_iota, ref, atol=1e-5)
    assert jnp.allclose(out_tiled, ref2, atol=1e-6)
    assert jnp.allclose(out_split, ref3, atol=1e-6)

    print("KERNEL_OK")
</pallas_src>

<mosaic_0001>
module attributes {stable_mosaic.version = 11 : i64} {
  func.func @_pos_emb_kernel(%arg0: i32, %arg1: memref<16x1xf32, #tpu.memory_space<vmem>>, %arg2: memref<1x16xf32, #tpu.memory_space<vmem>>, %arg3: memref<16x32xf32, #tpu.memory_space<vmem>>) attributes {dimension_semantics = [#tpu.dimension_semantics<parallel>], iteration_bounds = array<i64: 1>, scalar_prefetch = 0 : i64, scratch_operands = 0 : i64, tpu.core_type = #tpu.core_type<tc>, window_params = [{transform_indices = @transform_0, window_bounds = array<i64: 16, 1>}, {pipeline_mode = #tpu.pipeline_mode<synchronous>, transform_indices = @transform_1, window_bounds = array<i64: 1, 16>}, {transform_indices = @transform_2, window_bounds = array<i64: 16, 32>}]} {
    %c0 = arith.constant 0 : index
    %c0_0 = arith.constant 0 : index
    %0 = vector.load %arg1[%c0, %c0_0] : memref<16x1xf32, #tpu.memory_space<vmem>>, vector<16x1xf32>
    %c0_1 = arith.constant 0 : index
    %c0_2 = arith.constant 0 : index
    %1 = vector.load %arg2[%c0_1, %c0_2] : memref<1x16xf32, #tpu.memory_space<vmem>>, vector<1x16xf32>
    %2 = vector.broadcast %0 : vector<16x1xf32> to vector<16x16xf32>
    %3 = vector.broadcast %1 : vector<1x16xf32> to vector<16x16xf32>
    %4 = arith.mulf %2, %3 : vector<16x16xf32>
    %5 = math.sin %4 : vector<16x16xf32>
    %6 = math.cos %4 : vector<16x16xf32>
    %7 = tpu.concatenate %5, %6 in 1 : vector<16x16xf32>, vector<16x16xf32> -> vector<16x32xf32>
    %c0_3 = arith.constant 0 : index
    %c0_4 = arith.constant 0 : index
    %8 = vector.load %arg3[%c0_3, %c0_4] : memref<16x32xf32, #tpu.memory_space<vmem>>, vector<16x32xf32>
    tpu.vector_store %arg3[%c0_3, %c0_4], %7 {strides = array<i32>} : memref<16x32xf32, #tpu.memory_space<vmem>>, vector<16x32xf32>,
    return
  }
  func.func @transform_0(%arg0: i32) -> (i32, i32) {
    %c0_i32 = arith.constant 0 : i32
    %c0_i32_0 = arith.constant 0 : i32
    return %arg0, %c0_i32 : i32, i32
  }
  func.func @transform_1(%arg0: i32) -> (i32, i32) {
    %c0_i32 = arith.constant 0 : i32
    %c0_i32_0 = arith.constant 0 : i32
    %c0_i32_1 = arith.constant 0 : i32
    return %c0_i32, %c0_i32_0 : i32, i32
  }
  func.func @transform_2(%arg0: i32) -> (i32, i32) {
    %c0_i32 = arith.constant 0 : i32
    %c0_i32_0 = arith.constant 0 : i32
    return %arg0, %c0_i32 : i32, i32
  }
}

</mosaic_0001>

<bundles_post_ra>
// kernel: tpu_custom_call.1
= control target key start
LH: loop header
LB: loop body
LE: loop exit
PB: predicated region body
PF: predicated region fallthrough
CT: control target
= control target key end

     0   :  { %v731_v1 = vmov 0   ;;  %s945_s0 = inlined_call_operand.vmem [shape: f32[16,1], index: 0, kind: input, shape index: {}]   ;;  %s946_s1 = inlined_call_operand.vmem [shape: f32[1,16], index: 1, kind: input, shape index: {}]   ;;  %s947_s2 = inlined_call_operand.hbm [shape: f32[16,32], index: 2, kind: output, shape index: {}]  }
   0x1   :  { %v12_v0 = vld [vmem:[%s945_s0] sm:$0xff]  ;;  %703 = vset.pattern.permute.xlu0 %v731_v1 }
   0x2   :  { %17 = vperm.xlu0 %703, %v12_v0  }
   0x3   :  { %7 = vsyncpa [#allocation3], 0  ;;  %v13_v2 = vld [vmem:[%s945_s0 + $0x8] sm:$0xff]  ;;  %v704_v3 = vld [vmem:[%s946_s1] ss:$0 sm:$0xff]  ;;  %s738_s0 = smov 16  }
   0x4   :  { %v732_v26 = vmov 920167782   ;;  %v733_v28 = vmov 1326507024   ;;  %v734_v30 = vmov 2475754826  }
   0x5   :  { %v735_v32 = vmov 2102212464   ;;  %v736_v36 = vmov 2131351028   ;;  %v737_v39 = vmov 683565275  }
   0x6   :  { %s739_s1 = smov [#allocation2]   ;;  %s668_s18 = sshll.u32 %s947_s2, 4  ;;  %s669_s18 = int_to_ptr.hbm [resolvable:$true] %s668_s18 }
   0x7   :  { %s666_s15 = sshll.u32 %s739_s1, 4  ;;  %s740_s19 = smov 128   ;;  %s667_s15 = int_to_ptr.vmem [resolvable:$true] %s666_s15 }
   0x8   :  { %s741_s20 = smov 8  }
   0xa   :  { %22 = vperm.xlu0 %703, %v13_v2  }
  0x74   :  { %v18_v4 = vpop.permute.xlu0 %17 }
  0x75   :  { %v767_v5 = vmul.f32 %v704_v3, %v18_v4 }
  0x77   :  { %v33_v6 = vand.u32 2139095040, %v767_v5  ;;  %v30_v7 = vand.u32 2147483647, %v767_v5 }
  0x79   :  { %v34_v8 = vshrl.u32 %v33_v6, 23  ;;  %v37_v11 = vand.u32 8388607, %v30_v7 }
  0x7b   :  { %v680_v9 = vadd.s32 4294967169, %v34_v8  ;;  %v38_v17 = vor.u32 8388608, %v37_v11 }
  0x7c   :  { %v23_v10 = vpop.permute.xlu0 %22 }
  0x7d   :  { %v40_v12 = vadd.s32 1, %v680_v9  ;;  %v773_v13 = vmul.f32 %v704_v3, %v23_v10  ;;  %v779_v24 = vshll.u32 %v38_v17, 8 }
  0x7f   :  { %vm41_vm0 = vcmp.gt.s32.totalorder %v40_v12, 0  ;;  %v185_v14 = vand.u32 2147483647, %v773_v13  ;;  %v188_v15 = vand.u32 2139095040, %v773_v13  ;;  %v79_v50 = vand.u32 65535, %v779_v24 }
  0x80   :  { %v42_v16 = vsel %vm41_vm0, %v40_v12, 0  ;;  %v80_v51 = vshrl.u32 %v779_v24, 16 }
  0x81   :  { %v44_v18 = vand.u32 31, %v42_v16  ;;  %v189_v19 = vshrl.u32 %v188_v15, 23  ;;  %v192_v20 = vand.u32 8388607, %v185_v14  ;;  %v781_v25 = vshrl.u32 %v42_v16, 5 }
  0x83   :  { %v45_v21 = vsub.s32 32, %v44_v18  ;;  %v683_v22 = vadd.s32 4294967169, %v189_v19  ;;  %v193_v23 = vor.u32 8388608, %v192_v20  ;;  %v56_v33 = vshll.u32 %v735_v32, %v44_v18 }
  0x84   :  { %v59_v34 = vshll.u32 %v732_v26, %v44_v18  ;;  %v47_v40 = vshll.u32 %v737_v39, %v44_v18  ;;  %v50_v41 = vshll.u32 %v734_v30, %v44_v18  ;;  %v53_v44 = vshll.u32 %v736_v36, %v44_v18 }
  0x85   :  { %v57_v27 = vshrl.u32 %v732_v26, %v45_v21  ;;  %v60_v29 = vshrl.u32 %v733_v28, %v45_v21  ;;  %v48_v31 = vshrl.u32 %v734_v30, %v45_v21  ;;  %v195_v35 = vadd.s32 1, %v683_v22 }
  0x86   :  { %v51_v37 = vshrl.u32 %v736_v36, %v45_v21  ;;  %v783_v38 = vshll.u32 %v193_v23, 8  ;;  %v54_v42 = vshrl.u32 %v735_v32, %v45_v21  ;;  %vm65_vm2 = vcmp.lt.s32.totalorder %v781_v25, 4 }
  0x87   :  { %v58_v43 = vor.u32 %v57_v27, %v56_v33  ;;  %vm196_vm1 = vcmp.gt.s32.totalorder %v195_v35, 0  ;;  %v61_v45 = vor.u32 %v60_v29, %v59_v34  ;;  %v49_v47 = vor.u32 %v48_v31, %v47_v40 }
  0x88   :  { %v197_v46 = vsel %vm196_vm1, %v195_v35, 0  ;;  %v52_v48 = vor.u32 %v51_v37, %v50_v41  ;;  %v790_v52 = vand.u32 65535, %v783_v38  ;;  %v46_v53 = vshrl.u32 %v737_v39, %v45_v21 }
  0x89   :  { %v199_v49 = vand.u32 31, %v197_v46  ;;  %v55_v54 = vor.u32 %v54_v42, %v53_v44  ;;  %v71_v55 = vsel %vm65_vm2, %v58_v43, 920167782  ;;  %v798_v57 = vshrl.u32 %v783_v38, 16 }
  0x8a   :  { %vm62_vm3 = vcmp.lt.s32.totalorder %v781_v25, 1  ;;  %v75_v58 = vsel %vm65_vm2, %v61_v45, 1326507024  ;;  %v803_v59 = vshrl.u32 %v197_v46, 5  ;;  %vm64_vm4 = vcmp.lt.s32.totalorder %v781_v25, 3 }
  0x8b   :  { %v795_v56 = vsub.s32 32, %v199_v49  ;;  %v70_v60 = vsel %vm62_vm3, %v49_v47, %v52_v48  ;;  %v211_v62 = vshll.u32 %v735_v32, %v199_v49  ;;  %v214_v0 = vshll.u32 %v732_v26, %v199_v49 }
  0x8c   :  { %v72_v6 = vsel %vm64_vm4, %v55_v54, %v71_v55  ;;  %v202_v8 = vshll.u32 %v737_v39, %v199_v49  ;;  %v205_v9 = vshll.u32 %v734_v30, %v199_v49  ;;  %vm63_vm5 = vcmp.lt.s32.totalorder %v781_v25, 2 }
  0x8d   :  { %v203_v61 = vshrl.u32 %v734_v30, %v795_v56  ;;  %v212_v63 = vshrl.u32 %v732_v26, %v795_v56  ;;  %v206_v2 = vshrl.u32 %v736_v36, %v795_v56  ;;  %v209_v3 = vshrl.u32 %v735_v32, %v795_v56 }
  0x8e   :  { %v215_v4 = vshrl.u32 %v733_v28, %v795_v56  ;;  %v208_v11 = vshll.u32 %v736_v36, %v199_v49  ;;  %v73_v15 = vsel %vm63_vm5, %v70_v60, %v72_v6  ;;  %v74_v16 = vsel %vm62_vm3, %v52_v48, %v55_v54 }
  0x8f   :  { %v213_v10 = vor.u32 %v212_v63, %v211_v62  ;;  %v821_v17 = vor.u32 %v203_v61, %v202_v8  ;;  %vm220_vm6 = vcmp.lt.s32.totalorder %v803_v59, 4  ;;  %v67_v18 = vsel %vm65_vm2, %v55_v54, 2102212464 }
  0x90   :  { %v216_v12 = vor.u32 %v215_v4, %v214_v0  ;;  %v76_v19 = vsel %vm64_vm4, %v58_v43, %v75_v58  ;;  %v828_v20 = vor.u32 %v206_v2, %v205_v9  ;;  %v830_v21 = vor.u32 %v209_v3, %v208_v11 }
  0x91   :  { %v77_v22 = vsel %vm63_vm5, %v74_v16, %v76_v19  ;;  %v103_v23 = vand.u32 65535, %v73_v15  ;;  %v226_v26 = vsel %vm220_vm6, %v213_v10, 920167782  ;;  %v104_v29 = vshrl.u32 %v73_v15, 16 }
  0x92   :  { %v81_v27 = vand.u32 65535, %v77_v22  ;;  %v82_v28 = vshrl.u32 %v77_v22, 16  ;;  %vm217_vm7 = vcmp.lt.s32.totalorder %v803_v59, 1  ;;  %v230_v30 = vsel %vm220_vm6, %v216_v12, 1326507024 }
  0x93   :  { %v66_v31 = vsel %vm62_vm3, %v46_v53, %v49_v47  ;;  %v107_v32 = vmul.u32 %v103_v23, %v80_v51  ;;  %vm219_vm8 = vcmp.lt.s32.totalorder %v803_v59, 3  ;;  %v68_v33 = vsel %vm64_vm4, %v52_v48, %v67_v18 }
  0x94   :  { %v84_v34 = vmul.u32 %v82_v28, %v79_v50  ;;  %v85_v35 = vmul.u32 %v81_v27, %v80_v51  ;;  %v225_v36 = vsel %vm217_vm7, %v821_v17, %v828_v20  ;;  %v227_v37 = vsel %vm219_vm8, %v830_v21, %v226_v26 }
  0x95   :  { %v229_v40 = vsel %vm217_vm7, %v828_v20, %v830_v21  ;;  %v106_v41 = vmul.u32 %v104_v29, %v79_v50  ;;  %v231_v42 = vsel %vm219_vm8, %v213_v10, %v230_v30  ;;  %v83_v43 = vmul.u32 %v81_v27, %v79_v50 }
  0x96   :  { %v87_v44 = vshll.u32 %v84_v34, 16  ;;  %v105_v45 = vmul.u32 %v103_v23, %v79_v50  ;;  %v86_v46 = vmul.u32 %v82_v28, %v80_v51  ;;  %v108_v47 = vmul.u32 %v104_v29, %v80_v51 }
  0x97   :  { %v109_v48 = vshll.u32 %v106_v41, 16  ;;  %v111_v49 = vshll.u32 %v107_v32, 16  ;;  %v89_v53 = vshll.u32 %v85_v35, 16  ;;  %vm218_vm10 = vcmp.lt.s32.totalorder %v803_v59, 2 }
  0x98   :  { %vm91_vm9 = vc.u32 %v83_v43, %v87_v44  ;;  %v93_v54 = vadd.s32 %v87_v44, %v83_v43  ;;  %v228_v60 = vsel %vm218_vm10, %v225_v36, %v227_v37  ;;  %v88_v61 = vshrl.u32 %v84_v34, 16 }
  0x99   :  { %v92_v55 = vsel %vm91_vm9, 1, %v731_v1  ;;  %vm113_vm11 = vc.u32 %v105_v45, %v109_v48  ;;  %v115_v58 = vadd.s32 %v109_v48, %v105_v45  ;;  %v110_v63 = vshrl.u32 %v106_v41, 16 }
  0x9a   :  { %v94_v62 = vadd.s32 %v92_v55, %v86_v46  ;;  %vm95_vm12 = vc.u32 %v93_v54, %v89_v53  ;;  %v114_v50 = vsel %vm113_vm11, 1, %v731_v1  ;;  %v232_v4 = vsel %vm218_vm10, %v229_v40, %v231_v42 }
  0x9b   :  { %v96_v51 = vsel %vm95_vm12, 1, %v731_v1  ;;  %v116_v0 = vadd.s32 %v114_v50, %v108_v47  ;;  %vm117_vm13 = vc.u32 %v115_v58, %v111_v49  ;;  %v258_v6 = vand.u32 65535, %v228_v60 }
  0x9c   :  { %v98_v2 = vadd.s32 %v96_v51, %v94_v62  ;;  %v118_v3 = vsel %vm117_vm13, 1, %v731_v1  ;;  %v236_v9 = vand.u32 65535, %v232_v4  ;;  %v237_v10 = vshrl.u32 %v232_v4, 16 }
  0x9d   :  { %v120_v8 = vadd.s32 %v118_v3, %v116_v0  ;;  %v259_v11 = vshrl.u32 %v228_v60, 16  ;;  %v69_v12 = vsel %vm63_vm5, %v66_v31, %v68_v33  ;;  %v90_v15 = vshrl.u32 %v85_v35, 16 }
  0x9e   :  { %v99_v16 = vadd.s32 %v98_v2, %v88_v61  ;;  %v112_v18 = vshrl.u32 %v107_v32, 16  ;;  %v239_v22 = vmul.u32 %v237_v10, %v790_v52  ;;  %v240_v23 = vmul.u32 %v236_v9, %v798_v57 }
  0x9f   :  { %v121_v19 = vadd.s32 %v120_v8, %v110_v63  ;;  %v872_v27 = vadd.s32 %v115_v58, %v111_v49  ;;  %v261_v28 = vmul.u32 %v259_v11, %v790_v52  ;;  %v262_v29 = vmul.u32 %v258_v6, %v798_v57 }
  0xa0   :  { %v870_v26 = vadd.s32 %v99_v16, %v90_v15  ;;  %v123_v25 = vmul.u32 %v779_v24, %v69_v12  ;;  %v238_v31 = vmul.u32 %v236_v9, %v790_v52  ;;  %v242_v33 = vshll.u32 %v239_v22, 16 }
  0xa1   :  { %v122_v30 = vadd.s32 %v121_v19, %v112_v18  ;;  %v241_v32 = vmul.u32 %v237_v10, %v798_v57  ;;  %v260_v34 = vmul.u32 %v258_v6, %v790_v52  ;;  %v264_v35 = vshll.u32 %v261_v28, 16 }
  0xa2   :  { %vm125_vm14 = vc.u32 %v870_v26, %v872_v27  ;;  %v244_v37 = vshll.u32 %v240_v23, 16  ;;  %vm246_vm15 = vc.u32 %v238_v31, %v242_v33  ;;  %v248_v40 = vadd.s32 %v242_v33, %v238_v31 }
  0xa3   :  { %v126_v36 = vadd.s32 1, %v122_v30  ;;  %v247_v41 = vsel %vm246_vm15, 1, %v731_v1  ;;  %v263_v42 = vmul.u32 %v259_v11, %v798_v57  ;;  %v266_v24 = vshll.u32 %v262_v29, 16 }
  0xa4   :  { %vm268_vm0 = vc.u32 %v260_v34, %v264_v35  ;;  %v249_v44 = vadd.s32 %v247_v41, %v241_v32  ;;  %vm250_vm1 = vc.u32 %v248_v40, %v244_v37  ;;  %v270_v52 = vadd.s32 %v264_v35, %v260_v34 }
  0xa5   :  { %v127_v43 = vsel %vm125_vm14, %v126_v36, %v122_v30  ;;  %v269_v45 = vsel %vm268_vm0, 1, %v731_v1  ;;  %v251_v47 = vsel %vm250_vm1, 1, %v731_v1  ;;  %v243_v49 = vshrl.u32 %v239_v22, 16 }
  0xa6   :  { %v128_v46 = vadd.s32 %v127_v43, %v123_v25  ;;  %v271_v48 = vadd.s32 %v269_v45, %v263_v42  ;;  %v253_v53 = vadd.s32 %v251_v47, %v249_v44  ;;  %v222_v55 = vsel %vm220_vm6, %v830_v21, 2102212464 }
  0xa7   :  { %vm272_vm2 = vc.u32 %v270_v52, %v266_v24  ;;  %v201_v57 = vshrl.u32 %v737_v39, %v795_v56  ;;  %v245_v62 = vshrl.u32 %v240_v23, 16  ;;  %v265_v50 = vshrl.u32 %v261_v28, 16 }
  0xa8   :  { %v129_v54 = vadd.s32 536870912, %v128_v46  ;;  %v254_v58 = vadd.s32 %v253_v53, %v243_v49  ;;  %v273_v60 = vsel %vm272_vm2, 1, %v731_v1  ;;  %v223_v0 = vsel %vm219_vm8, %v828_v20, %v222_v55 }
  0xa9   :  { %v275_v51 = vadd.s32 %v273_v60, %v271_v48  ;;  %v221_v63 = vsel %vm217_vm7, %v201_v57, %v821_v17  ;;  %v267_v3 = vshrl.u32 %v262_v29, 16  ;;  %v274_v56 = vadd.s32 %v270_v52, %v266_v24 }
  0xaa   :  { %v130_v61 = vshrl.u32 %v129_v54, 30  ;;  %v255_v2 = vadd.s32 %v254_v58, %v245_v62  ;;  %v224_v1 = vsel %vm218_vm10, %v221_v63, %v223_v0  ;;  %v124_v59 = vadd.s32 %v872_v27, %v870_v26 }
  0xab   :  { %v276_v4 = vadd.s32 %v275_v51, %v265_v50  ;;  %v278_v17 = vmul.u32 %v783_v38, %v224_v1  ;;  %vm908_vm8 = vcmp.le.f32.partialorder %v30_v7, 0.7853982  ;;  %vm32_vm9 = vcmp.lt.s32.totalorder %v767_v5, 0 }
  0xac   :  { %v131_v21 = vshll.u32 %v130_v61, 30  ;;  %vm280_vm4 = vc.u32 %v255_v2, %v274_v56  ;;  %v154_v26 = vsub.s32 4, %v130_v61  ;;  %v279_v45 = vadd.s32 %v274_v56, %v255_v2 }
  0xad   :  { %v277_v6 = vadd.s32 %v276_v4, %v267_v3  ;;  %vm187_vm10 = vcmp.lt.s32.totalorder %v773_v13, 0  ;;  %vm921_vm11 = vcmp.le.f32.partialorder %v185_v14, 0.7853982  ;;  %vm173_vm12 = vweird.f32 %v767_v5 }
  0xae   :  { %v132_v39 = vsub.s32 %v128_v46, %v131_v21  ;;  %v155_v52 = vsel %vm32_vm9, %v154_v26, %v130_v61 }
  0xaf   :  { %v281_v9 = vadd.s32 1, %v277_v6  ;;  %v157_v62 = vsel %vm908_vm8, 0, %v155_v52 }
  0xb0   :  { %vm133_vm3 = vcmp.lt.s32.totalorder %v132_v39, 0  ;;  %v134_v8 = vsub.s32 0, %v132_v39  ;;  %v174_v3 = vadd.s32 3, %v157_v62 }
  0xb1   :  { %v282_v12 = vsel %vm280_vm4, %v281_v9, %v277_v6 }
  0xb2   :  { %v135_v10 = vsel %vm133_vm3, %v134_v8, %v132_v39  ;;  %v283_v20 = vadd.s32 %v282_v12, %v278_v17  ;;  %v175_v9 = vand.u32 3, %v174_v3 }
  0xb3   :  { %v136_v11 = vclz %v135_v10  ;;  %v484_v10 = vand.u32 3, %v157_v62 }
  0xb4   :  { %v284_v16 = vadd.s32 536870912, %v283_v20  ;;  %vm180_vm13 = vcmp.eq.s32.totalorder %v175_v9, 2  ;;  %vm176_vm0 = vcmp.lt.s32.totalorder %v175_v9, 2  ;;  %vm177_vm1 = vcmp.eq.s32.totalorder %v175_v9, 0 }
  0xb5   :  { %v681_v15 = vadd.s32 4294967294, %v136_v11  ;;  %vm485_vm14 = vcmp.lt.s32.totalorder %v484_v10, 2  ;;  %vm486_vm15 = vcmp.eq.s32.totalorder %v484_v10, 0  ;;  %vm489_vm2 = vcmp.eq.s32.totalorder %v484_v10, 2 }
  0xb6   :  { %v901_v19 = vshrl.u32 %v284_v16, 30 }
  0xb7   :  { %vm682_vm5 = vcmp.lt.s32.totalorder %v681_v15, 0 }
  0xb8   :  { %v139_v18 = vsel %vm682_vm5, 0, %v681_v15  ;;  %v286_v28 = vshll.u32 %v901_v19, 30  ;;  %v309_v15 = vsub.s32 4, %v901_v19 }
  0xb9   :  { %v140_v22 = vsub.s32 32, %v139_v18  ;;  %v144_v23 = vsub.s32 4294967266, %v139_v18  ;;  %v141_v29 = vshll.u32 %v132_v39, %v139_v18 }
  0xba   :  { %v287_v38 = vsub.s32 %v283_v20, %v286_v28  ;;  %v310_v28 = vsel %vm187_vm10, %v309_v15, %v901_v19 }
  0xbb   :  { %v142_v30 = vshrl.u32 %v124_v59, %v140_v22  ;;  %v145_v25 = vadd.s32 127, %v144_v23 }
  0xbc   :  { %vm288_vm6 = vcmp.lt.s32.totalorder %v287_v38, 0  ;;  %v289_v32 = vsub.s32 0, %v287_v38 }
  0xbd   :  { %v143_v31 = vor.u32 %v142_v30, %v141_v29  ;;  %v146_v33 = vshll.u32 %v145_v25, 23 }
  0xbe   :  { %v290_v35 = vsel %vm288_vm6, %v289_v32, %v287_v38 }
  0xbf   :  { %v147_v34 = vor.u32 4788187, %v146_v33  ;;  %v150_v37 = vcvt.s32.f32 %v143_v31  ;;  %v291_v40 = vclz %v290_v35  ;;  %v312_v35 = vsel %vm921_vm11, 0, %v310_v28 }
  0xc0   :  { %v329_v26 = vadd.s32 3, %v312_v35  ;;  %v638_v52 = vand.u32 3, %v312_v35 }
  0xc1   :  { %v148_v36 = vand.u32 2147483647, %v147_v34  ;;  %v684_v42 = vadd.s32 4294967294, %v291_v40 }
  0xc2   :  { %vm639_vm5 = vcmp.lt.s32.totalorder %v638_v52, 2  ;;  %vm640_vm6 = vcmp.eq.s32.totalorder %v638_v52, 0 }
  0xc3   :  { %v151_v41 = vmul.f32 %v150_v37, %v148_v36  ;;  %vm685_vm7 = vcmp.lt.s32.totalorder %v684_v42, 0 }
  0xc4   :  { %v294_v43 = vsel %vm685_vm7, 0, %v684_v42  ;;  %vm643_vm7 = vcmp.eq.s32.totalorder %v638_v52, 2 }
  0xc5   :  { %v152_v27 = vxor.u32 2147483648, %v151_v41  ;;  %v295_v46 = vsub.s32 32, %v294_v43  ;;  %v299_v47 = vsub.s32 4294967266, %v294_v43  ;;  %v296_v53 = vshll.u32 %v287_v38, %v294_v43 }
  0xc7   :  { %v153_v44 = vsel %vm32_vm9, %v152_v27, %v151_v41  ;;  %v297_v54 = vshrl.u32 %v279_v45, %v295_v46  ;;  %v300_v55 = vadd.s32 127, %v299_v47  ;;  %v330_v45 = vand.u32 3, %v329_v26 }
  0xc8   :  { %v156_v48 = vsel %vm908_vm8, %v767_v5, %v153_v44  ;;  %vm328_vm9 = vweird.f32 %v773_v13 }
  0xc9   :  { %v158_v49 = vmul.f32 %v156_v48, %v156_v48  ;;  %v298_v58 = vor.u32 %v297_v54, %v296_v53  ;;  %v301_v60 = vshll.u32 %v300_v55, 23  ;;  %vm335_vm3 = vcmp.eq.s32.totalorder %v330_v45, 2 }
  0xca   :  { %vm332_vm4 = vcmp.eq.s32.totalorder %v330_v45, 0  ;;  %vm331_vm8 = vcmp.lt.s32.totalorder %v330_v45, 2 }
  0xcb   :  { %v159_v7 = vmul.f32 -0.001358992, %v158_v49  ;;  %v166_v57 = vmul.f32 -0.00019511016, %v158_v49  ;;  %v302_v63 = vor.u32 4788187, %v301_v60  ;;  %v305_v2 = vcvt.s32.f32 %v298_v58 }
  0xcd   :  { %v160_v50 = vadd.f32 0.041655596, %v159_v7  ;;  %v167_v51 = vadd.f32 0.008332121, %v166_v57  ;;  %v303_v21 = vand.u32 2147483647, %v302_v63 }
  0xcf   :  { %v161_v0 = vmul.f32 %v160_v50, %v158_v49  ;;  %v168_v61 = vmul.f32 %v167_v51, %v158_v49  ;;  %v306_v56 = vmul.f32 %v305_v2, %v303_v21 }
  0xd1   :  { %v162_v4 = vadd.f32 -0.4999988, %v161_v0  ;;  %v169_v39 = vadd.f32 -0.16666654, %v168_v61  ;;  %v307_v8 = vxor.u32 2147483648, %v306_v56 }
  0xd3   :  { %v163_v6 = vmul.f32 %v162_v4, %v158_v49  ;;  %v170_v1 = vmul.f32 %v169_v39, %v158_v49  ;;  %v308_v20 = vsel %vm187_vm10, %v307_v8, %v306_v56  ;;  %vm656_vm10 = vcmask 130048  }
  0xd4   :  { %v311_v16 = vsel %vm921_vm11, %v773_v13, %v308_v20  ;;  %vm659_vm11 = vcmask 261120  }
  0xd5   :  { %v164_v11 = vadd.f32 1.0, %v163_v6  ;;  %v171_v12 = vadd.f32 1.0, %v170_v1  ;;  %v313_v22 = vmul.f32 %v311_v16, %v311_v16 }
  0xd7   :  { %v172_v18 = vmul.f32 %v171_v12, %v156_v48  ;;  %v181_v59 = vxor.u32 2147483648, %v164_v11  ;;  %v314_v29 = vmul.f32 -0.001358992, %v313_v22  ;;  %v321_v30 = vmul.f32 -0.00019511016, %v313_v22 }
  0xd9   :  { %v178_v14 = vxor.u32 2147483648, %v172_v18  ;;  %v182_v23 = vsel %vm180_vm13, %v181_v59, %v172_v18  ;;  %v491_v38 = vsel %vm489_vm2, %v181_v59, %v172_v18  ;;  %v315_v33 = vadd.f32 0.041655596, %v314_v29 }
  0xda   :  { %v322_v36 = vadd.f32 0.008332121, %v321_v30 }
  0xdb   :  { %v488_v25 = vsel %vm486_vm15, %v164_v11, %v178_v14  ;;  %v179_v31 = vsel %vm177_vm1, %v164_v11, %v178_v14  ;;  %v316_v40 = vmul.f32 %v315_v33, %v313_v22 }
  0xdc   :  { %v492_v32 = vsel %vm485_vm14, %v488_v25, %v491_v38  ;;  %v183_v34 = vsel %vm176_vm0, %v179_v31, %v182_v23  ;;  %v323_v41 = vmul.f32 %v322_v36, %v313_v22 }
  0xdd   :  { %v493_v37 = vsel %vm173_vm12, nan, %v492_v32  ;;  %v184_v19 = vsel %vm173_vm12, nan, %v183_v34  ;;  %v317_v42 = vadd.f32 -0.4999988, %v316_v40 }
  0xde   :  { %650 = vrot.lane.b32.xlu1 %v493_v37, %s738_s0  ;;  %v324_v27 = vadd.f32 -0.16666654, %v323_v41 }
  0xdf   :  { %v318_v24 = vmul.f32 %v317_v42, %v313_v22 }
  0xe0   :  { %v325_v43 = vmul.f32 %v324_v27, %v313_v22 }
  0xe1   :  { %v319_v44 = vadd.f32 1.0, %v318_v24 }
  0xe2   :  { %v326_v46 = vadd.f32 1.0, %v325_v43 }
  0xe3   :  { %v336_v47 = vxor.u32 2147483648, %v319_v44 }
  0xe4   :  { %v327_v48 = vmul.f32 %v326_v46, %v311_v16 }
  0xe6   :  { %v333_v49 = vxor.u32 2147483648, %v327_v48  ;;  %v337_v53 = vsel %vm335_vm3, %v336_v47, %v327_v48  ;;  %v645_v54 = vsel %vm643_vm7, %v336_v47, %v327_v48 }
  0xe8   :  { %v642_v5 = vsel %vm640_vm6, %v319_v44, %v333_v49  ;;  %v334_v55 = vsel %vm332_vm4, %v319_v44, %v333_v49 }
  0xe9   :  { %v646_v7 = vsel %vm639_vm5, %v642_v5, %v645_v54  ;;  %v338_v57 = vsel %vm331_vm8, %v334_v55, %v337_v53 }
  0xea   :  { %v647_v58 = vsel %vm328_vm9, nan, %v646_v7  ;;  %v339_v60 = vsel %vm328_vm9, nan, %v338_v57 }
  0xeb   :  { %652 = vrot.lane.b32.xlu1 %v647_v58, %s738_s0 }
 0x150   :  { %v651_v62 = vpop.permute.xlu1 %650 }
 0x151   :  { %v657_v50 = vsel %vm656_vm10, %v184_v19, %v651_v62 }
 0x152   :  { %660 = vst.msk [vmem:[#allocation2] sm:$0xff] %vm659_vm11, %v657_v50 }
 0x15d   :  { %v653_v51 = vpop.permute.xlu1 %652 }
 0x15e   :  { %v658_v13 = vsel %vm656_vm10, %v339_v60, %v653_v51 }
 0x15f   :  { %661 = vst.msk [vmem:[#allocation2 + $0x8] sm:$0xff] %vm659_vm11, %v658_v13 }
 0x160   :  { %674 = dma.vmem_to_hbm [thread:$0]  %s667_s15, 256, %s669_s18, [#allocation3], %s740_s19, %s740_s19, %s741_s20  }
 0x161   :  { %729 = dma.done.wait [#allocation3], 256  }
 0x162   :  { %730 = vsyncadd [#allocation3], 4294967040 }
 0x163   :  { %679 = vsyncpa [#allocation3], 1 }

</bundles_post_ra>
